<compile_context>
chip_gen: v7x
topology: tpu7x:2x2x1
jax: 0.10.0
libtpu: 0.0.40
codegen_flags: <defaults>
</compile_context>

<pallas_src>
import functools

import jax
import jax.numpy as jnp
import numpy as np
from jax.experimental import pallas as pl
from jax.experimental.pallas import tpu as pltpu

EPS = 1e-5  # PyTorch nn.LayerNorm default


def _layernorm(h, g, b):
    """LayerNorm over the last dim (biased variance, like torch.nn.LayerNorm)."""
    mu = jnp.mean(h, axis=-1, keepdims=True)
    var = jnp.mean((h - mu) ** 2, axis=-1, keepdims=True)
    return (h - mu) * jax.lax.rsqrt(var + EPS) * g + b


def encoding_block_kernel(n_heads, attn_size, compute_dtype,
                          x_ref, vec_ref, wqkv_ref, wo_ref, w12_ref, out_ref):
    H, A = n_heads, attn_size
    cd = compute_dtype
    f32 = jnp.float32

    x = x_ref[...]                       # (S, E) f32 -- one batch element per grid step
    S = x.shape[0]
    E = x.shape[1]

    vecs = vec_ref[...]                  # (9, E) f32 packed vectors
    g0, b0, bo = vecs[0:1], vecs[1:2], vecs[2:3]
    g1, be1 = vecs[3:4], vecs[4:5]
    bf1, bf2 = vecs[5:6], vecs[6:7]
    g2, be2 = vecs[7:8], vecs[8:9]

    # ---- norm0 (f32 VPU math) ----
    xn = _layernorm(x, g0, b0)           # (S, E) f32
    xn_cd = xn.astype(cd)

    # ---- fused Q/K/V projection: one head-batched matmul against the stacked (3H,E,A)
    #      bf16 weight (1/sqrt(A) already folded into the q block wrapper-side).
    #      The 6 KiB broadcast is required for Mosaic's batched dot_general. ----
    xn_b = jnp.broadcast_to(xn_cd[None], (3 * H, S, E))
    qkv = jnp.einsum('hse,hea->hsa', xn_b, wqkv_ref[...],
                     preferred_element_type=f32).astype(cd)       # (3H, S, A) bf16
    fq = qkv[0:H]                                                 # leading-dim splits (free)
    fk = qkv[H:2 * H]
    fv = qkv[2 * H:3 * H]

    # ---- scores + softmax over keys (mask=None path; torch clamp(min,max) is identity) ----
    scores = jnp.einsum('hqa,hka->hqk', fq, fk,
                        preferred_element_type=f32)               # (H, S, S) f32
    m = jnp.max(scores, axis=-1, keepdims=True)
    p = jnp.exp(scores - m)
    denom = jnp.sum(p, axis=-1, keepdims=True)
    ps = (p * pl.reciprocal(denom, approx=True)).astype(cd)       # EUP reciprocal

    ctx = jnp.einsum('hqk,hka->hqa', ps, fv,
                     preferred_element_type=f32).astype(cd)       # (H, S, A) bf16

    # ---- output projection; heads merge as sum_h ctx_h @ Wo_h (no concat / transpose) ----
    proj = jnp.einsum('hsa,hae->hse', ctx, wo_ref[...],
                      preferred_element_type=f32)                 # (H, S, E) f32
    attn_out = jnp.sum(proj, axis=0) + bo                         # (S, E) f32

    # ---- dropout(p=0) is identity; residual + norm1 ----
    x1 = _layernorm(attn_out + xn, g1, be1)

    # ---- fwd_net: Linear -> ReLU -> Linear (bf16 weights, f32 accumulation) ----
    h1 = jnp.maximum(
        jnp.dot(x1.astype(cd), w12_ref[0], preferred_element_type=f32) + bf1, 0.0)
    h2 = jnp.dot(h1.astype(cd), w12_ref[1], preferred_element_type=f32) + bf2

    # ---- residual + norm2 ----
    out_ref[...] = _layernorm(h2 + x1, g2, be2)


def encoding_block(x, params, n_heads, attn_size, compute_dtype=jnp.bfloat16):
    B, S, E = x.shape
    H, A = n_heads, attn_size
    cd = compute_dtype

    # Flatten rows: each grid step works on one (S, E) batch slice of the (B*S, E) slab.
    x2 = x.reshape(B * S, E)

    inv_div = 1.0 / float(np.sqrt(A))

    # --- wrapper-side (XLA, free) parameter prep: head-major reshape, scale fold, bf16 cast ---
    wq_h = params["wq"].reshape(E, H, A).transpose(1, 0, 2) * inv_div   # (H,E,A) scale folded
    wk_h = params["wk"].reshape(E, H, A).transpose(1, 0, 2)             # (H,E,A)
    wv_h = params["wv"].reshape(E, H, A).transpose(1, 0, 2)             # (H,E,A)
    wqkv = jnp.concatenate([wq_h, wk_h, wv_h], axis=0).astype(cd)       # (3H, E, A) bf16
    wo_h = params["wo"].reshape(H, A, E).astype(cd)                     # (H, A, E)  bf16
    w12 = jnp.stack([params["w1"], params["w2"]], axis=0).astype(cd)    # (2, E, E)  bf16

    # Pack the nine (1,E) vectors into a single (9,E) f32 slab.
    vecs = jnp.concatenate(
        [params["g0"], params["b0"], params["bo"],
         params["g1"], params["be1"], params["bf1"],
         params["bf2"], params["g2"], params["be2"]], axis=0)           # (9, E) f32

    kernel = functools.partial(encoding_block_kernel, H, A, cd)
    out = pl.pallas_call(
        kernel,
        out_shape=jax.ShapeDtypeStruct((B * S, E), jnp.float32),
        grid=(B,),
        in_specs=[
            pl.BlockSpec((S, E), lambda b: (b, 0)),            # per-batch activation block
            pl.BlockSpec((9, E), lambda b: (0, 0)),            # packed vectors  (resident)
            pl.BlockSpec((3 * H, E, A), lambda b: (0, 0, 0)),  # fused QKV weight (resident)
            pl.BlockSpec((H, A, E), lambda b: (0, 0, 0)),      # output proj weight (resident)
            pl.BlockSpec((2, E, E), lambda b: (0, 0, 0)),      # MLP weights     (resident)
        ],
        out_specs=pl.BlockSpec((S, E), lambda b: (b, 0)),
        compiler_params=pltpu.CompilerParams(
            # Batch elements are independent -> parallel (uses both TCs on v7x; neutral on
            # single-TC v5e/v6e).
            dimension_semantics=("parallel",),
            # <= 48 MiB keeps headroom on v7x's 64 MiB VMEM; far more than needed here.
            vmem_limit_bytes=48 * 1024 * 1024,
        ),
    )(x2, vecs, wqkv, wo_h, w12)
    return out.reshape(B, S, E)


# ---------------- pure-JAX reference (mirrors the PyTorch forward, f32) ----------------
def encoding_block_ref(x, params, n_heads, attn_size):
    def ln(h, g, b):
        mu = jnp.mean(h, axis=-1, keepdims=True)
        var = jnp.mean((h - mu) ** 2, axis=-1, keepdims=True)
        return (h - mu) * jax.lax.rsqrt(var + EPS) * g[0] + b[0]

    B, S, E = x.shape
    H, A = n_heads, attn_size
    xn = ln(x, params["g0"], params["b0"])
    fq = (xn @ params["wq"]).reshape(B, S, H, A).transpose(0, 2, 1, 3)  # (B,H,S,A)
    fk = (xn @ params["wk"]).reshape(B, S, H, A).transpose(0, 2, 3, 1)  # (B,H,A,S)
    fv = (xn @ params["wv"]).reshape(B, S, H, A).transpose(0, 2, 1, 3)  # (B,H,S,A)
    f = jnp.matmul(fq, fk) / float(np.sqrt(A))                          # (B,H,S,S)
    ps = jax.nn.softmax(f, axis=-1)
    attns = jnp.matmul(ps, fv).transpose(0, 2, 1, 3).reshape(B, S, H * A)
    attn_out = attns @ params["wo"] + params["bo"][0]
    x1 = ln(attn_out + xn, params["g1"], params["be1"])
    h1 = jnp.maximum(x1 @ params["w1"] + params["bf1"][0], 0.0)
    h2 = h1 @ params["w2"] + params["bf2"][0]
    return ln(h2 + x1, params["g2"], params["be2"])


def make_params(key, emb_size, attn_size, n_heads):
    E, A, H = emb_size, attn_size, n_heads
    HA = A * H
    xavier_scale = float(np.sqrt((E + HA) / 2))
    ks = jax.random.split(key, 12)
    f32 = jnp.float32
    params = {
        # LayerNorm params (PyTorch default init: gamma=1, beta=0)
        "g0": jnp.ones((1, E), f32),  "b0": jnp.zeros((1, E), f32),
        "g1": jnp.ones((1, E), f32),  "be1": jnp.zeros((1, E), f32),
        "g2": jnp.ones((1, E), f32),  "be2": jnp.zeros((1, E), f32),
        # attention projections: randn / xavier_scale (as in MultiHeadAttention.__init__)
        "wq": (jax.random.normal(ks[0], (E, HA), f32) / xavier_scale),
        "wk": (jax.random.normal(ks[1], (E, HA), f32) / xavier_scale),
        "wv": (jax.random.normal(ks[2], (E, HA), f32) / xavier_scale),
        # output Linear(HA, E) (stored pre-transposed: (HA, E))
        "wo": jax.random.uniform(ks[3], (HA, E), f32, -1.0, 1.0) / np.sqrt(HA),
        "bo": jax.random.uniform(ks[4], (1, E), f32, -1.0, 1.0) / np.sqrt(HA),
        # fwd_net Linear(E,E) -> ReLU -> Linear(E,E) (stored pre-transposed: (E, E))
        "w1": jax.random.uniform(ks[5], (E, E), f32, -1.0, 1.0) / np.sqrt(E),
        "bf1": jax.random.uniform(ks[6], (1, E), f32, -1.0, 1.0) / np.sqrt(E),
        "w2": jax.random.uniform(ks[7], (E, E), f32, -1.0, 1.0) / np.sqrt(E),
        "bf2": jax.random.uniform(ks[8], (1, E), f32, -1.0, 1.0) / np.sqrt(E),
    }
    return params


if __name__ == "__main__":
    B, S, E = 2, 8, 32
    n_heads, attn_size = 4, 16

    key = jax.random.PRNGKey(0)
    kx, kp = jax.random.split(key)
    x = jax.random.normal(kx, (B, S, E), jnp.float32)
    params = make_params(kp, E, attn_size, n_heads)

    out = encoding_block(x, params, n_heads, attn_size)
    out = jax.block_until_ready(out)

    ref = encoding_block_ref(x, params, n_heads, attn_size)
    # Tolerance loosened vs. pure f32: kernel matmul operands are bf16 (f32 accumulation) and
    # the softmax uses the approximate EUP reciprocal.  Outputs are LayerNorm'd (O(1)), so
    # 5e-2 still catches structural bugs.
    np.testing.assert_allclose(np.asarray(out), np.asarray(ref), rtol=5e-2, atol=5e-2)

    # TODO(synk): prob_embs / prob_attn (gaussian re-parameterized sampling) and the
    # mask / q_mask / k_mask paths are not exercised (defaults False / None); dropout(p=0)
    # is identity.
    print("KERNEL_OK")
</pallas_src>

<mosaic_0001>
module attributes {stable_mosaic.version = 11 : i64} {
  func.func @encoding_block_kernel(%arg0: i32, %arg1: memref<8x32xf32, #tpu.memory_space<vmem>>, %arg2: memref<9x32xf32, #tpu.memory_space<vmem>>, %arg3: memref<12x32x16xbf16, #tpu.memory_space<vmem>>, %arg4: memref<4x16x32xbf16, #tpu.memory_space<vmem>>, %arg5: memref<2x32x32xbf16, #tpu.memory_space<vmem>>, %arg6: memref<8x32xf32, #tpu.memory_space<vmem>>) attributes {dimension_semantics = [#tpu.dimension_semantics<parallel>], iteration_bounds = array<i64: 2>, scalar_prefetch = 0 : i64, scratch_operands = 0 : i64, tpu.core_type = #tpu.core_type<tc>, window_params = [{transform_indices = @transform_0, window_bounds = array<i64: 8, 32>}, {pipeline_mode = #tpu.pipeline_mode<synchronous>, transform_indices = @transform_1, window_bounds = array<i64: 9, 32>}, {pipeline_mode = #tpu.pipeline_mode<synchronous>, transform_indices = @transform_2, window_bounds = array<i64: 12, 32, 16>}, {pipeline_mode = #tpu.pipeline_mode<synchronous>, transform_indices = @transform_3, window_bounds = array<i64: 4, 16, 32>}, {pipeline_mode = #tpu.pipeline_mode<synchronous>, transform_indices = @transform_4, window_bounds = array<i64: 2, 32, 32>}, {transform_indices = @transform_5, window_bounds = array<i64: 8, 32>}]} {
    %c0 = arith.constant 0 : index
    %c0_0 = arith.constant 0 : index
    %0 = vector.load %arg1[%c0, %c0_0] : memref<8x32xf32, #tpu.memory_space<vmem>>, vector<8x32xf32>
    %c0_1 = arith.constant 0 : index
    %c0_2 = arith.constant 0 : index
    %1 = vector.load %arg2[%c0_1, %c0_2] : memref<9x32xf32, #tpu.memory_space<vmem>>, vector<9x32xf32>
    %2 = vector.extract_strided_slice %1 {offsets = [0, 0], sizes = [1, 32], strides = [1, 1]} : vector<9x32xf32> to vector<1x32xf32>
    %3 = vector.extract_strided_slice %1 {offsets = [1, 0], sizes = [1, 32], strides = [1, 1]} : vector<9x32xf32> to vector<1x32xf32>
    %4 = vector.extract_strided_slice %1 {offsets = [2, 0], sizes = [1, 32], strides = [1, 1]} : vector<9x32xf32> to vector<1x32xf32>
    %5 = vector.extract_strided_slice %1 {offsets = [3, 0], sizes = [1, 32], strides = [1, 1]} : vector<9x32xf32> to vector<1x32xf32>
    %6 = vector.extract_strided_slice %1 {offsets = [4, 0], sizes = [1, 32], strides = [1, 1]} : vector<9x32xf32> to vector<1x32xf32>
    %7 = vector.extract_strided_slice %1 {offsets = [5, 0], sizes = [1, 32], strides = [1, 1]} : vector<9x32xf32> to vector<1x32xf32>
    %8 = vector.extract_strided_slice %1 {offsets = [6, 0], sizes = [1, 32], strides = [1, 1]} : vector<9x32xf32> to vector<1x32xf32>
    %9 = vector.extract_strided_slice %1 {offsets = [7, 0], sizes = [1, 32], strides = [1, 1]} : vector<9x32xf32> to vector<1x32xf32>
    %10 = vector.extract_strided_slice %1 {offsets = [8, 0], sizes = [1, 32], strides = [1, 1]} : vector<9x32xf32> to vector<1x32xf32>
    %cst = arith.constant dense<0.000000e+00> : vector<8xf32>
    %11 = vector.multi_reduction <add>, %0, %cst [1] : vector<8x32xf32> to vector<8xf32>
    %12 = vector.shape_cast %11 : vector<8xf32> to vector<8x1xf32>
    %cst_3 = arith.constant 3.200000e+01 : f32
    %13 = vector.broadcast %cst_3 : f32 to vector<8x1xf32>
    %14 = arith.divf %12, %13 : vector<8x1xf32>
    %15 = vector.broadcast %14 : vector<8x1xf32> to vector<8x32xf32>
    %16 = arith.subf %0, %15 : vector<8x32xf32>
    %17 = arith.mulf %16, %16 : vector<8x32xf32>
    %cst_4 = arith.constant dense<0.000000e+00> : vector<8xf32>
    %18 = vector.multi_reduction <add>, %17, %cst_4 [1] : vector<8x32xf32> to vector<8xf32>
    %19 = vector.shape_cast %18 : vector<8xf32> to vector<8x1xf32>
    %cst_5 = arith.constant 3.200000e+01 : f32
    %20 = vector.broadcast %cst_5 : f32 to vector<8x1xf32>
    %21 = arith.divf %19, %20 : vector<8x1xf32>
    %22 = vector.broadcast %14 : vector<8x1xf32> to vector<8x32xf32>
    %23 = arith.subf %0, %22 : vector<8x32xf32>
    %cst_6 = arith.constant 9.99999974E-6 : f32
    %24 = vector.broadcast %cst_6 : f32 to vector<8x1xf32>
    %25 = arith.addf %21, %24 : vector<8x1xf32>
    %26 = math.rsqrt %25 : vector<8x1xf32>
    %27 = vector.broadcast %26 : vector<8x1xf32> to vector<8x32xf32>
    %28 = arith.mulf %23, %27 : vector<8x32xf32>
    %29 = vector.broadcast %2 : vector<1x32xf32> to vector<8x32xf32>
    %30 = arith.mulf %28, %29 : vector<8x32xf32>
    %31 = vector.broadcast %3 : vector<1x32xf32> to vector<8x32xf32>
    %32 = arith.addf %30, %31 : vector<8x32xf32>
    %33 = arith.truncf %32 : vector<8x32xf32> to vector<8x32xbf16>
    %34 = vector.shape_cast %33 : vector<8x32xbf16> to vector<1x8x32xbf16>
    %35 = vector.shape_cast %34 : vector<1x8x32xbf16> to vector<1x8x32xbf16>
    %36 = vector.broadcast %35 : vector<1x8x32xbf16> to vector<12x8x32xbf16>
    %c0_7 = arith.constant 0 : index
    %c0_8 = arith.constant 0 : index
    %c0_9 = arith.constant 0 : index
    %37 = vector.load %arg3[%c0_7, %c0_8, %c0_9] : memref<12x32x16xbf16, #tpu.memory_space<vmem>>, vector<12x32x16xbf16>
    "tpu.trace_start"() <{level = 10 : i32, message = "hse,hea->hsa"}> : () -> ()
    %cst_10 = arith.constant dense<0.000000e+00> : vector<12x8x16xf32>
    %38 = tpu.matmul %36, %37, %cst_10 {dimension_numbers = #tpu.dot_dimension_numbers<[2], [1], [1], [2], [0, 0, 0, 1, 1, 2], [0], [0]>} : vector<12x8x32xbf16>, vector<12x32x16xbf16>, vector<12x8x16xf32> -> vector<12x8x16xf32>
    "tpu.trace_stop"() : () -> ()
    %39 = arith.truncf %38 : vector<12x8x16xf32> to vector<12x8x16xbf16>
    %40 = vector.extract_strided_slice %39 {offsets = [0, 0, 0], sizes = [4, 8, 16], strides = [1, 1, 1]} : vector<12x8x16xbf16> to vector<4x8x16xbf16>
    %41 = vector.extract_strided_slice %39 {offsets = [4, 0, 0], sizes = [4, 8, 16], strides = [1, 1, 1]} : vector<12x8x16xbf16> to vector<4x8x16xbf16>
    %42 = vector.extract_strided_slice %39 {offsets = [8, 0, 0], sizes = [4, 8, 16], strides = [1, 1, 1]} : vector<12x8x16xbf16> to vector<4x8x16xbf16>
    "tpu.trace_start"() <{level = 10 : i32, message = "hqa,hka->hqk"}> : () -> ()
    %cst_11 = arith.constant dense<0.000000e+00> : vector<4x8x8xf32>
    %43 = tpu.matmul %40, %41, %cst_11 {dimension_numbers = #tpu.dot_dimension_numbers<[2], [2], [1], [1], [0, 0, 0, 1, 1, 1], [0], [0]>} : vector<4x8x16xbf16>, vector<4x8x16xbf16>, vector<4x8x8xf32> -> vector<4x8x8xf32>
    "tpu.trace_stop"() : () -> ()
    %cst_12 = arith.constant dense<0xFF800000> : vector<4x8xf32>
    %44 = vector.multi_reduction <maximumf>, %43, %cst_12 [2] : vector<4x8x8xf32> to vector<4x8xf32>
    %45 = vector.shape_cast %44 : vector<4x8xf32> to vector<4x8x1xf32>
    %46 = vector.broadcast %45 : vector<4x8x1xf32> to vector<4x8x8xf32>
    %47 = arith.subf %43, %46 : vector<4x8x8xf32>
    %48 = math.exp %47 : vector<4x8x8xf32>
    %cst_13 = arith.constant dense<0.000000e+00> : vector<4x8xf32>
    %49 = vector.multi_reduction <add>, %48, %cst_13 [2] : vector<4x8x8xf32> to vector<4x8xf32>
    %50 = vector.shape_cast %49 : vector<4x8xf32> to vector<4x8x1xf32>
    %51 = tpu.reciprocal %50 {approx = true} : vector<4x8x1xf32> -> vector<4x8x1xf32>
    %52 = vector.broadcast %51 : vector<4x8x1xf32> to vector<4x8x8xf32>
    %53 = arith.mulf %48, %52 : vector<4x8x8xf32>
    %54 = arith.truncf %53 : vector<4x8x8xf32> to vector<4x8x8xbf16>
    "tpu.trace_start"() <{level = 10 : i32, message = "hqk,hka->hqa"}> : () -> ()
    %cst_14 = arith.constant dense<0.000000e+00> : vector<4x8x16xf32>
    %55 = tpu.matmul %54, %42, %cst_14 {dimension_numbers = #tpu.dot_dimension_numbers<[2], [1], [1], [2], [0, 0, 0, 1, 1, 2], [0], [0]>} : vector<4x8x8xbf16>, vector<4x8x16xbf16>, vector<4x8x16xf32> -> vector<4x8x16xf32>
    "tpu.trace_stop"() : () -> ()
    %56 = arith.truncf %55 : vector<4x8x16xf32> to vector<4x8x16xbf16>
    %c0_15 = arith.constant 0 : index
    %c0_16 = arith.constant 0 : index
    %c0_17 = arith.constant 0 : index
    %57 = vector.load %arg4[%c0_15, %c0_16, %c0_17] : memref<4x16x32xbf16, #tpu.memory_space<vmem>>, vector<4x16x32xbf16>
    "tpu.trace_start"() <{level = 10 : i32, message = "hsa,hae->hse"}> : () -> ()
    %cst_18 = arith.constant dense<0.000000e+00> : vector<4x8x32xf32>
    %58 = tpu.matmul %56, %57, %cst_18 {dimension_numbers = #tpu.dot_dimension_numbers<[2], [1], [1], [2], [0, 0, 0, 1, 1, 2], [0], [0]>} : vector<4x8x16xbf16>, vector<4x16x32xbf16>, vector<4x8x32xf32> -> vector<4x8x32xf32>
    "tpu.trace_stop"() : () -> ()
    %cst_19 = arith.constant dense<0.000000e+00> : vector<8x32xf32>
    %59 = vector.multi_reduction <add>, %58, %cst_19 [0] : vector<4x8x32xf32> to vector<8x32xf32>
    %60 = vector.broadcast %4 : vector<1x32xf32> to vector<8x32xf32>
    %61 = arith.addf %59, %60 : vector<8x32xf32>
    %62 = arith.addf %61, %32 : vector<8x32xf32>
    %cst_20 = arith.constant dense<0.000000e+00> : vector<8xf32>
    %63 = vector.multi_reduction <add>, %62, %cst_20 [1] : vector<8x32xf32> to vector<8xf32>
    %64 = vector.shape_cast %63 : vector<8xf32> to vector<8x1xf32>
    %cst_21 = arith.constant 3.200000e+01 : f32
    %65 = vector.broadcast %cst_21 : f32 to vector<8x1xf32>
    %66 = arith.divf %64, %65 : vector<8x1xf32>
    %67 = vector.broadcast %66 : vector<8x1xf32> to vector<8x32xf32>
    %68 = arith.subf %62, %67 : vector<8x32xf32>
    %69 = arith.mulf %68, %68 : vector<8x32xf32>
    %cst_22 = arith.constant dense<0.000000e+00> : vector<8xf32>
    %70 = vector.multi_reduction <add>, %69, %cst_22 [1] : vector<8x32xf32> to vector<8xf32>
    %71 = vector.shape_cast %70 : vector<8xf32> to vector<8x1xf32>
    %cst_23 = arith.constant 3.200000e+01 : f32
    %72 = vector.broadcast %cst_23 : f32 to vector<8x1xf32>
    %73 = arith.divf %71, %72 : vector<8x1xf32>
    %74 = vector.broadcast %66 : vector<8x1xf32> to vector<8x32xf32>
    %75 = arith.subf %62, %74 : vector<8x32xf32>
    %cst_24 = arith.constant 9.99999974E-6 : f32
    %76 = vector.broadcast %cst_24 : f32 to vector<8x1xf32>
    %77 = arith.addf %73, %76 : vector<8x1xf32>
    %78 = math.rsqrt %77 : vector<8x1xf32>
    %79 = vector.broadcast %78 : vector<8x1xf32> to vector<8x32xf32>
    %80 = arith.mulf %75, %79 : vector<8x32xf32>
    %81 = vector.broadcast %5 : vector<1x32xf32> to vector<8x32xf32>
    %82 = arith.mulf %80, %81 : vector<8x32xf32>
    %83 = vector.broadcast %6 : vector<1x32xf32> to vector<8x32xf32>
    %84 = arith.addf %82, %83 : vector<8x32xf32>
    %85 = arith.truncf %84 : vector<8x32xf32> to vector<8x32xbf16>
    %c0_25 = arith.constant 0 : index
    %c0_26 = arith.constant 0 : index
    %c0_27 = arith.constant 0 : index
    %86 = vector.load %arg5[%c0_25, %c0_26, %c0_27] : memref<2x32x32xbf16, #tpu.memory_space<vmem>>, vector<1x32x32xbf16>
    %87 = vector.shape_cast %86 : vector<1x32x32xbf16> to vector<32x32xbf16>
    %cst_28 = arith.constant dense<0.000000e+00> : vector<8x32xf32>
    %88 = tpu.matmul %85, %87, %cst_28 {dimension_numbers = #tpu.dot_dimension_numbers<[1], [0], [0], [1], [0, 0, 1, 1], [], []>} : vector<8x32xbf16>, vector<32x32xbf16>, vector<8x32xf32> -> vector<8x32xf32>
    %89 = vector.broadcast %7 : vector<1x32xf32> to vector<8x32xf32>
    %90 = arith.addf %88, %89 : vector<8x32xf32>
    %cst_29 = arith.constant 0.000000e+00 : f32
    %91 = vector.broadcast %cst_29 : f32 to vector<8x32xf32>
    %92 = arith.maximumf %90, %91 : vector<8x32xf32>
    %93 = arith.truncf %92 : vector<8x32xf32> to vector<8x32xbf16>
    %c1 = arith.constant 1 : index
    %c0_30 = arith.constant 0 : index
    %c0_31 = arith.constant 0 : index
    %94 = vector.load %arg5[%c1, %c0_30, %c0_31] : memref<2x32x32xbf16, #tpu.memory_space<vmem>>, vector<1x32x32xbf16>
    %95 = vector.shape_cast %94 : vector<1x32x32xbf16> to vector<32x32xbf16>
    %cst_32 = arith.constant dense<0.000000e+00> : vector<8x32xf32>
    %96 = tpu.matmul %93, %95, %cst_32 {dimension_numbers = #tpu.dot_dimension_numbers<[1], [0], [0], [1], [0, 0, 1, 1], [], []>} : vector<8x32xbf16>, vector<32x32xbf16>, vector<8x32xf32> -> vector<8x32xf32>
    %97 = vector.broadcast %8 : vector<1x32xf32> to vector<8x32xf32>
    %98 = arith.addf %96, %97 : vector<8x32xf32>
    %99 = arith.addf %98, %84 : vector<8x32xf32>
    %cst_33 = arith.constant dense<0.000000e+00> : vector<8xf32>
    %100 = vector.multi_reduction <add>, %99, %cst_33 [1] : vector<8x32xf32> to vector<8xf32>
    %101 = vector.shape_cast %100 : vector<8xf32> to vector<8x1xf32>
    %cst_34 = arith.constant 3.200000e+01 : f32
    %102 = vector.broadcast %cst_34 : f32 to vector<8x1xf32>
    %103 = arith.divf %101, %102 : vector<8x1xf32>
    %104 = vector.broadcast %103 : vector<8x1xf32> to vector<8x32xf32>
    %105 = arith.subf %99, %104 : vector<8x32xf32>
    %106 = arith.mulf %105, %105 : vector<8x32xf32>
    %cst_35 = arith.constant dense<0.000000e+00> : vector<8xf32>
    %107 = vector.multi_reduction <add>, %106, %cst_35 [1] : vector<8x32xf32> to vector<8xf32>
    %108 = vector.shape_cast %107 : vector<8xf32> to vector<8x1xf32>
    %cst_36 = arith.constant 3.200000e+01 : f32
    %109 = vector.broadcast %cst_36 : f32 to vector<8x1xf32>
    %110 = arith.divf %108, %109 : vector<8x1xf32>
    %111 = vector.broadcast %103 : vector<8x1xf32> to vector<8x32xf32>
    %112 = arith.subf %99, %111 : vector<8x32xf32>
    %cst_37 = arith.constant 9.99999974E-6 : f32
    %113 = vector.broadcast %cst_37 : f32 to vector<8x1xf32>
    %114 = arith.addf %110, %113 : vector<8x1xf32>
    %115 = math.rsqrt %114 : vector<8x1xf32>
    %116 = vector.broadcast %115 : vector<8x1xf32> to vector<8x32xf32>
    %117 = arith.mulf %112, %116 : vector<8x32xf32>
    %118 = vector.broadcast %9 : vector<1x32xf32> to vector<8x32xf32>
    %119 = arith.mulf %117, %118 : vector<8x32xf32>
    %120 = vector.broadcast %10 : vector<1x32xf32> to vector<8x32xf32>
    %121 = arith.addf %119, %120 : vector<8x32xf32>
    %c0_38 = arith.constant 0 : index
    %c0_39 = arith.constant 0 : index
    %122 = vector.load %arg6[%c0_38, %c0_39] : memref<8x32xf32, #tpu.memory_space<vmem>>, vector<8x32xf32>
    tpu.vector_store %arg6[%c0_38, %c0_39], %121 {strides = array<i32>} : memref<8x32xf32, #tpu.memory_space<vmem>>, vector<8x32xf32>,
    return
  }
  func.func @transform_0(%arg0: i32) -> (i32, i32) {
    %c0_i32 = arith.constant 0 : i32
    %c0_i32_0 = arith.constant 0 : i32
    return %arg0, %c0_i32 : i32, i32
  }
  func.func @transform_1(%arg0: i32) -> (i32, i32) {
    %c0_i32 = arith.constant 0 : i32
    %c0_i32_0 = arith.constant 0 : i32
    %c0_i32_1 = arith.constant 0 : i32
    return %c0_i32, %c0_i32_0 : i32, i32
  }
  func.func @transform_2(%arg0: i32) -> (i32, i32, i32) {
    %c0_i32 = arith.constant 0 : i32
    %c0_i32_0 = arith.constant 0 : i32
    %c0_i32_1 = arith.constant 0 : i32
    %c0_i32_2 = arith.constant 0 : i32
    return %c0_i32, %c0_i32_0, %c0_i32_1 : i32, i32, i32
  }
  func.func @transform_3(%arg0: i32) -> (i32, i32, i32) {
    %c0_i32 = arith.constant 0 : i32
    %c0_i32_0 = arith.constant 0 : i32
    %c0_i32_1 = arith.constant 0 : i32
    %c0_i32_2 = arith.constant 0 : i32
    return %c0_i32, %c0_i32_0, %c0_i32_1 : i32, i32, i32
  }
  func.func @transform_4(%arg0: i32) -> (i32, i32, i32) {
    %c0_i32 = arith.constant 0 : i32
    %c0_i32_0 = arith.constant 0 : i32
    %c0_i32_1 = arith.constant 0 : i32
    %c0_i32_2 = arith.constant 0 : i32
    return %c0_i32, %c0_i32_0, %c0_i32_1 : i32, i32, i32
  }
  func.func @transform_5(%arg0: i32) -> (i32, i32) {
    %c0_i32 = arith.constant 0 : i32
    %c0_i32_0 = arith.constant 0 : i32
    return %arg0, %c0_i32 : i32, i32
  }
}

</mosaic_0001>

<bundles_post_ra>
// kernel: tpu_custom_call.1
= control target key start
LH: loop header
LB: loop body
LE: loop exit
PB: predicated region body
PF: predicated region fallthrough
CT: control target
= control target key end

     0   :  { %10 = vsyncpa [#allocation3], 0  ;;  %s2743_s0 = inlined_call_operand.vmem [shape: f32[16,32], index: 0, kind: input, shape index: {}]   ;;  %s2744_s1 = inlined_call_operand.vmem [shape: f32[9,32], index: 1, kind: input, shape index: {}]   ;;  %s2745_s2 = inlined_call_operand.vmem [shape: bf16[12,32,16], index: 2, kind: input, shape index: {}]   ;;  %s2746_s3 = inlined_call_operand.vmem [shape: bf16[4,16,32], index: 3, kind: input, shape index: {}]   ;;  %s2747_s4 = inlined_call_operand.vmem [shape: bf16[2,32,32], index: 4, kind: input, shape index: {}]   ;;  %s2748_s5 = inlined_call_operand.hbm [shape: f32[16,32], index: 5, kind: output, shape index: {}]  }
   0x1   :  { %12 = vsyncpa [#allocation3 + $0x1], 0  ;;  %s2343_s18 = smov 0   ;;  %s2345_s19 = smov 0  }
   0x2   :  { %s2347_s20 = smov 0   ;;  %s2349_s21 = smov 0  }
   0x3 LB: > { %s2364_s22 = sadd.s32 4294967295, %s2308_s21   ;;  %s1828_s23 = sadd.s32 4294967294, %s2308_s21   ;;  %s2308_s21 = sphi %s2349_s21, %s2754_s21   ;;  %s2304_s20 = sphi %s2347_s20, %s2753_s20   ;;  %s2300_s19 = sphi %s2345_s19, %s2752_s19   ;;  %s2296_s18 = sphi %s2343_s18, %s2751_s18  }
   0x4   : > { %s2368_s24 = sadd.s32 1, %s2308_s21   ;;  %s135_s25 = sadd.s32 1, %s2304_s20 }
   0x5   : > { %s132_s26 = ssub.s32 %s2308_s21, %s2368_s24  ;;  %p145_p0 = scmp.ne.s32.totalorder %s2304_s20, %s2300_s19 }
   0x6   : > { %p133_p1 = scmp.eq.s32.totalorder %s132_s26, 0  ;;  %p146_p2 = scmp.eq.s32.totalorder %s2364_s22, 1 }
   0x7   : > { %p151_p3 = scmp.ne.s32.totalorder %s2300_s19, %s2296_s18  ;;  %p152_p4 = scmp.eq.s32.totalorder %s1828_s23, 1 }
   0x8   : > { %s2379_s27 = scalar_select %p133_p1, %s2304_s20, %s135_s25  }
   0x9   : > { %p2381_p5 = por %p146_p2, %p145_p0  ;;  %p2385_p6 = por %p152_p4, %p151_p3 }
   0xa   : > { %p1831_p7 = scmp.ge.s32.totalorder %s2308_s21, 1  ;;  %p189_p8 = scmp.lt.s32.totalorder %s2308_s21, 3 }
   0xc   : > { %p190_p9 = pnand %p1831_p7, %p189_p8 }
   0xd   : > { %p216_p10 = scmp.lt.s32.totalorder (!%p190_p9), %s2364_s22, 1  ;;  %vm224_vm0 = vcmask (!%p190_p9), 261120   ;;  %v2192_v7 = vld [vmem:[%s2745_s2] sm:$0xff] (!%p190_p9)   ;;  %v2193_v8 = vld [vmem:[%s2745_s2 + $0x10] sm:$0xff] (!%p190_p9)   ;;  %v2310_v9 = vmov (!%p190_p9), 0.0   ;;  %v2194_v10 = vld [vmem:[%s2745_s2 + $0x8] sm:$0xff] (!%p190_p9)   ;;  %v239_v14 = vlaneseq (!%p190_p9) }
   0xe   : > { %193 = sbr.rel (%p190_p9) target bundleno = 2628 (0xa44), region = 40  ;;  %1967 = vmatprep.subr.bf16.mxu0 (!%p190_p9), %v2310_v9  ;;  %1975 = vmatprep.subr.bf16.mxu1 (!%p190_p9), %v2310_v9  ;;  %v2195_v11 = vld [vmem:[%s2745_s2 + $0x18] sm:$0xff] (!%p190_p9)   ;;  %vm2311_vm1 = vmmov (!%p190_p9), 0   ;;  %v2426_v18 = vld [vmem:[%s2744_s1] sm:$0xff] (!%p190_p9)  ;;  %v2197_v27 = vld [vmem:[%s2745_s2 + $0x30] sm:$0xff] (!%p190_p9)   ;;  %vm937_vm2 = vcmask (!%p190_p9), 130048  }
   0xf   : > { %1968 = vmatpush3.bf16.msra.mxu0 (!%p190_p9), %v2192_v7  ;;  %1976 = vmatpush3.bf16.msra.mxu1 (!%p190_p9), %v2193_v8  ;;  %v2420_v16 = vshrl.u32 (!%p190_p9), %v239_v14, 7  ;;  %v2196_v26 = vld [vmem:[%s2745_s2 + $0x20] sm:$0xff] (!%p190_p9)   ;;  %v2198_v29 = vld [vmem:[%s2745_s2 + $0x28] sm:$0xff] (!%p190_p9)   ;;  %v2199_v30 = vld [vmem:[%s2745_s2 + $0x38] sm:$0xff] (!%p190_p9)   ;;  %vm1174_vm3 = vcmask (!%p190_p9), 1043456   ;;  %vm1122_vm4 = vcmask (!%p190_p9), 64512  }
  0x10   : > { %1969 = vmatprep.subr.bf16.mxu0 (!%p190_p9), %v2310_v9  ;;  %1977 = vmatprep.subr.bf16.mxu1 (!%p190_p9), %v2310_v9  ;;  %v2200_v31 = vld [vmem:[%s2745_s2 + $0x40] sm:$0xff] (!%p190_p9)   ;;  %v2201_v32 = vld [vmem:[%s2745_s2 + $0x50] sm:$0xff] (!%p190_p9)   ;;  %v2202_v33 = vld [vmem:[%s2745_s2 + $0x48] sm:$0xff] (!%p190_p9)   ;;  %s213_s12 = sand.u32 (!%p190_p9), 1, %s2300_s19   ;;  %s1898_s16 = sshll.u32 (!%p190_p9), %s2364_s22, 7 }
  0x11   : > { %1971 = vmatprep.mubr.msk.bf16.mxu0 (!%p190_p9), %vm2311_vm1, %v2310_v9  ;;  %1979 = vmatprep.mubr.msk.bf16.mxu1 (!%p190_p9), %vm2311_vm1, %v2310_v9  ;;  %v241_v17 = vsub.s32 (!%p190_p9), 0, %v2420_v16  ;;  %v246_v19 = vsub.s32 (!%p190_p9), 1, %v2420_v16  ;;  %v2203_v34 = vld [vmem:[%s2745_s2 + $0x58] sm:$0xff] (!%p190_p9)   ;;  %v2204_v35 = vld [vmem:[%s2745_s2 + $0x60] sm:$0xff] (!%p190_p9)   ;;  %v2205_v36 = vld [vmem:[%s2745_s2 + $0x70] sm:$0xff] (!%p190_p9)   ;;  %s1832_s13 = sshll.u32 (!%p190_p9), %s213_s12, 3 }
  0x12   : > { %v2206_v37 = vld [vmem:[%s2745_s2 + $0x68] sm:$0xff] (!%p190_p9)   ;;  %v2207_v38 = vld [vmem:[%s2745_s2 + $0x78] sm:$0xff] (!%p190_p9)   ;;  %v2208_v39 = vld [vmem:[%s2745_s2 + $0x80] sm:$0xff] (!%p190_p9)   ;;  %s215_s17 = scalar_lea.vmem (!%p190_p9), [#allocation2], %s1832_s13 }
  0x13   : > { %1970 = vmatpush3.bf16.msra.mxu0 (!%p190_p9), %v2194_v10  ;;  %1978 = vmatpush3.bf16.msra.mxu1 (!%p190_p9), %v2195_v11  ;;  %v242_v20 = vrot.slane (!%p190_p9), %v2426_v18, %v241_v17  ;;  %v247_v22 = vrot.slane (!%p190_p9), %v2426_v18, %v246_v19  ;;  %v2209_v40 = vld [vmem:[%s2745_s2 + $0x90] sm:$0xff] (!%p190_p9)   ;;  %v2210_v41 = vld [vmem:[%s2745_s2 + $0x88] sm:$0xff] (!%p190_p9)   ;;  %v2211_v42 = vld [vmem:[%s2745_s2 + $0x98] sm:$0xff] (!%p190_p9)   ;;  %s1769_s23 = sshll.u32 (!%p190_p9), %s215_s17, 4  ;;  %s2702_s23 = int_to_ptr.vmem [resolvable:$true] %s1769_s23 }
  0x14   : > { %1983 = vmatprep.subr.bf16.mxu0 (!%p190_p9), %v2310_v9  ;;  %1991 = vmatprep.subr.bf16.mxu1 (!%p190_p9), %v2310_v9  ;;  %v2212_v43 = vld [vmem:[%s2745_s2 + $0xa0] sm:$0xff] (!%p190_p9)   ;;  %v2213_v44 = vld [vmem:[%s2745_s2 + $0xb0] sm:$0xff] (!%p190_p9)   ;;  %v2214_v45 = vld [vmem:[%s2745_s2 + $0xa8] sm:$0xff] (!%p190_p9)   ;;  %s2246_s7 = scalar_lea.vmem (!%p190_p9), %s2702_s23, 128 }
  0x15   : > { %s217_s30 = scalar_select %p216_p10, %s2364_s22, 1  ;;  %v2215_v46 = vld [vmem:[%s2745_s2 + $0xb8] sm:$0xff]  }
  0x16   : > { %p2247_p11 = scmp.ne.s32.totalorder %s2702_s23, %s2246_s7  ;;  %s2312_s22 = smov [#allocation2]  }
  0x17   : > { %s1833_s6 = sshll.u32 %s217_s30, 3  ;;  %s2700_s30 = scalar_lea.hbm %s2748_s5, %s1898_s16 }
  0x18   : > { %s219_s9 = scalar_lea.vmem %s2743_s0, %s1833_s6  ;;  %s1756_s6 = scalar_lea.sflag [#allocation3], %s213_s12 }
  0x19   : > { %v221_v0 = vld [vmem:[%s219_s9] sm:$0xff]  ;;  %p2248_p12 = pnand %p2247_p11, %p2381_p5  ;;  %s2250_s8 = sshll.u32 %s2312_s22, 4  ;;  %s2251_s8 = int_to_ptr.vmem [resolvable:$false] %s2250_s8 }
  0x1a   : > { %v225_v1 = vsel %vm224_vm0, %v221_v0, 0.0  ;;  %s2252_s9 = scalar_lea.vmem %s2251_s8, 256  ;;  %p2253_p0 = scmp.lt.s32.totalorder %s2702_s23, %s2251_s8 }
  0x1b   : > { %226 = vadd.xlane.f32.xlu0 %v225_v1  ;;  %p2249_p13 = pneg %p2248_p12  ;;  %p2254_p1 = scmp.lt.s32.totalorder %s2252_s9, %s2246_s7 }
  0x1d   : > { %p2255_p2 = por %p2254_p1, %p2253_p0 }
  0x1f   : > { %p2256_p3 = pnand %p2255_p2, %p2249_p13 }
  0xa8   : > { %v227_v2 = vpop.xlane.xlu0 %226 }
  0xa9   : > { %v229_v3 = vmul.f32 0.03125, %v227_v2 }
  0xab   : > { %v230_v4 = vsub.f32 %v221_v0, %v229_v3 }
  0xad   : > { %v231_v5 = vmul.f32 %v230_v4, %v230_v4 }
  0xaf   : > { %v232_v6 = vsel %vm224_vm0, %v231_v5, 0.0 }
  0xb0   : > { %233 = vadd.xlane.f32.xlu0 %v232_v6 }
 0x13d   : > { %v234_v12 = vpop.xlane.xlu0 %233 }
 0x13e   : > { %v235_v13 = vmul.f32 0.03125, %v234_v12 }
 0x140   : > { %v236_v15 = vadd.f32 1e-05, %v235_v13 }
 0x142   : > { %2224 = vrsqrt.f32 %v236_v15 }
 0x14c   : > { %v2225_v21 = vpop.eup %2224 }
 0x14d   : > { %v238_v23 = vmul.f32 %v2225_v21, %v230_v4 }
 0x14f   : > { %v243_v24 = vmul.f32 %v242_v20, %v238_v23 }
 0x151   : > { %v2431_v25 = vadd.f32 %v247_v22, %v243_v24 }
 0x153   : > { %v2441_v28 = vpack.c.bf16 %v2431_v25, %v2431_v25 }
 0x155   : > { %1972 = vmatmul.mubr.msk.bf16.vlgmr.msra.gmra.mrb[0].mxu0 %vm224_vm0, %v2441_v28  ;;  %1980 = vmatmul.mubr.msk.bf16.vlgmr.msra.gmra.mrb[0].mxu1 %vm224_vm0, %v2441_v28 }
 0x156   : > { %1984 = vmatpush3.bf16.msra.mxu0 %v2196_v26  ;;  %1992 = vmatpush3.bf16.msra.mxu1 %v2197_v27 }
 0x157   : > { %1985 = vmatprep.subr.bf16.mxu0 %v2310_v9  ;;  %1993 = vmatprep.subr.bf16.mxu1 %v2310_v9 }
 0x158   : > { %1987 = vmatprep.mubr.msk.bf16.mxu0 %vm2311_vm1, %v2310_v9  ;;  %1995 = vmatprep.mubr.msk.bf16.mxu1 %vm2311_vm1, %v2310_v9 }
 0x15a   : > { %1986 = vmatpush3.bf16.msra.mxu0 %v2198_v29  ;;  %1994 = vmatpush3.bf16.msra.mxu1 %v2199_v30 }
 0x15b   : > { %1999 = vmatprep.subr.bf16.mxu0 %v2310_v9  ;;  %2007 = vmatprep.subr.bf16.mxu1 %v2310_v9 }
 0x15d   : > { %1988 = vmatmul.mubr.msk.bf16.vlgmr.msra.gmra.mrb[4].mxu0 %vm224_vm0, %v2441_v28  ;;  %1996 = vmatmul.mubr.msk.bf16.vlgmr.msra.gmra.mrb[4].mxu1 %vm224_vm0, %v2441_v28 }
 0x15e   : > { %2000 = vmatpush3.bf16.msra.mxu0 %v2200_v31  ;;  %2008 = vmatpush3.bf16.msra.mxu1 %v2201_v32 }
 0x15f   : > { %2001 = vmatprep.subr.bf16.mxu0 %v2310_v9  ;;  %2009 = vmatprep.subr.bf16.mxu1 %v2310_v9 }
 0x160   : > { %2003 = vmatprep.mubr.msk.bf16.mxu0 %vm2311_vm1, %v2310_v9  ;;  %2011 = vmatprep.mubr.msk.bf16.mxu1 %vm2311_vm1, %v2310_v9 }
 0x162   : > { %2002 = vmatpush3.bf16.msra.mxu0 %v2202_v33  ;;  %2010 = vmatpush3.bf16.msra.mxu1 %v2203_v34 }
 0x163   : > { %2015 = vmatprep.subr.bf16.mxu0 %v2310_v9  ;;  %2023 = vmatprep.subr.bf16.mxu1 %v2310_v9 }
 0x165   : > { %2004 = vmatmul.mubr.msk.bf16.vlgmr.msra.gmra.mrb[8].mxu0 %vm224_vm0, %v2441_v28  ;;  %2012 = vmatmul.mubr.msk.bf16.vlgmr.msra.gmra.mrb[8].mxu1 %vm224_vm0, %v2441_v28 }
 0x166   : > { %2016 = vmatpush3.bf16.msra.mxu0 %v2204_v35  ;;  %2024 = vmatpush3.bf16.msra.mxu1 %v2205_v36 }
 0x167   : > { %2017 = vmatprep.subr.bf16.mxu0 %v2310_v9  ;;  %2025 = vmatprep.subr.bf16.mxu1 %v2310_v9 }
 0x168   : > { %2019 = vmatprep.mubr.msk.bf16.mxu0 %vm2311_vm1, %v2310_v9  ;;  %2027 = vmatprep.mubr.msk.bf16.mxu1 %vm2311_vm1, %v2310_v9 }
 0x16a   : > { %2018 = vmatpush3.bf16.msra.mxu0 %v2206_v37  ;;  %2026 = vmatpush3.bf16.msra.mxu1 %v2207_v38 }
 0x16b   : > { %2031 = vmatprep.subr.bf16.mxu0 %v2310_v9  ;;  %2039 = vmatprep.subr.bf16.mxu1 %v2310_v9 }
 0x16d   : > { %2020 = vmatmul.mubr.msk.bf16.vlgmr.msra.gmra.mrb[12].mxu0 %vm224_vm0, %v2441_v28  ;;  %2028 = vmatmul.mubr.msk.bf16.vlgmr.msra.gmra.mrb[12].mxu1 %vm224_vm0, %v2441_v28 }
 0x16e   : > { %2032 = vmatpush3.bf16.msra.mxu0 %v2208_v39  ;;  %2040 = vmatpush3.bf16.msra.mxu1 %v2209_v40 }
 0x16f   : > { %2033 = vmatprep.subr.bf16.mxu0 %v2310_v9  ;;  %2041 = vmatprep.subr.bf16.mxu1 %v2310_v9 }
 0x170   : > { %2035 = vmatprep.mubr.msk.bf16.mxu0 %vm2311_vm1, %v2310_v9  ;;  %2043 = vmatprep.mubr.msk.bf16.mxu1 %vm2311_vm1, %v2310_v9 }
 0x172   : > { %2034 = vmatpush3.bf16.msra.mxu0 %v2210_v41  ;;  %2042 = vmatpush3.bf16.msra.mxu1 %v2211_v42 }
 0x173   : > { %2047 = vmatprep.subr.bf16.mxu0 %v2310_v9  ;;  %2055 = vmatprep.subr.bf16.mxu1 %v2310_v9 }
 0x175   : > { %2036 = vmatmul.mubr.msk.bf16.vlgmr.msra.gmra.mrb[16].mxu0 %vm224_vm0, %v2441_v28  ;;  %2044 = vmatmul.mubr.msk.bf16.vlgmr.msra.gmra.mrb[16].mxu1 %vm224_vm0, %v2441_v28 }
 0x176   : > { %2048 = vmatpush3.bf16.msra.mxu0 %v2212_v43  ;;  %2056 = vmatpush3.bf16.msra.mxu1 %v2213_v44 }
 0x177   : > { %2049 = vmatprep.subr.bf16.mxu0 %v2310_v9  ;;  %2057 = vmatprep.subr.bf16.mxu1 %v2310_v9 }
 0x178   : > { %2051 = vmatprep.mubr.msk.bf16.mxu0 %vm2311_vm1, %v2310_v9  ;;  %2059 = vmatprep.mubr.msk.bf16.mxu1 %vm2311_vm1, %v2310_v9 }
 0x17a   : > { %2050 = vmatpush3.bf16.msra.mxu0 %v2214_v45  ;;  %2058 = vmatpush3.bf16.msra.mxu1 %v2215_v46 }
 0x17b   : > { %2063 = vmatprep.subr.bf16.mxu0 %v2310_v9  ;;  %2069 = vmatprep.subr.bf16.mxu1 %v2310_v9 }
 0x17d   : > { %2052 = vmatmul.mubr.msk.bf16.vlgmr.msra.gmra.mrb[20].mxu0 %vm224_vm0, %v2441_v28  ;;  %2060 = vmatmul.mubr.msk.bf16.vlgmr.msra.gmra.mrb[20].mxu1 %vm224_vm0, %v2441_v28 }
 0x17e   : > { %2065 = vmatprep.mubr.msk.bf16.mxu0 %vm2311_vm1, %v2310_v9  ;;  %2071 = vmatprep.mubr.msk.bf16.mxu1 %vm2311_vm1, %v2310_v9 }
 0x228   : > { %v347_v47 = vpop.f32.mrb[0].mxu0  ;;  %v399_v48 = vpop.f32.mrb[0].mxu1 }
 0x229   : > { %v1973_v49 = vpop.f32.mrb[1].mxu0  ;;  %v1981_v50 = vpop.f32.mrb[1].mxu1  ;;  %v925_v14 = vpack.c.bf16 %v347_v47, %v347_v47  ;;  %v926_v15 = vpack.c.bf16 %v399_v48, %v399_v48 }
 0x22a   : > { %v350_v51 = vpop.f32.mrb[2].mxu0  ;;  %v402_v52 = vpop.f32.mrb[2].mxu1 }
 0x22b   : > { %v1974_v53 = vpop.f32.mrb[3].mxu0  ;;  %v1982_v54 = vpop.f32.mrb[3].mxu1 }
 0x230   : > { %v2565_v55 = vpop.f32.mrb[4].mxu0  ;;  %v2567_v56 = vpop.f32.mrb[4].mxu1 }
 0x231   : > { %v1989_v57 = vpop.f32.mrb[5].mxu0  ;;  %v1997_v58 = vpop.f32.mrb[5].mxu1  ;;  %v927_v31 = vpack.c.bf16 %v2565_v55, %v2565_v55  ;;  %v928_v32 = vpack.c.bf16 %v2567_v56, %v2567_v56 }
 0x232   : > { %v454_v59 = vpop.f32.mrb[6].mxu0  ;;  %v506_v60 = vpop.f32.mrb[6].mxu1 }
 0x233   : > { %v1990_v61 = vpop.f32.mrb[7].mxu0  ;;  %v1998_v62 = vpop.f32.mrb[7].mxu1 }
 0x238   : > { %v555_v63 = vpop.f32.mrb[8].mxu0  ;;  %v607_v0 = vpop.f32.mrb[8].mxu1 }
 0x239   : > { %v929_v1 = vpack.c.bf16 %v555_v63, %v555_v63  ;;  %v930_v2 = vpack.c.bf16 %v607_v0, %v607_v0  ;;  %v2005_v3 = vpop.f32.mrb[9].mxu0  ;;  %v2013_v4 = vpop.f32.mrb[9].mxu1 }
 0x23a   : > { %v558_v5 = vpop.f32.mrb[10].mxu0  ;;  %v610_v6 = vpop.f32.mrb[10].mxu1 }
 0x23b   : > { %v942_v7 = vsel %vm937_vm2, %v929_v1, 0  ;;  %v988_v8 = vsel %vm937_vm2, %v930_v2, 0  ;;  %v2006_v10 = vpop.f32.mrb[11].mxu0  ;;  %v2014_v11 = vpop.f32.mrb[11].mxu1 }
 0x23c   : > { %2064 = vmatpush3.bf16.xpose.msra.mxu0 %v942_v7  ;;  %2070 = vmatpush3.bf16.xpose.msra.mxu1 %v988_v8 }
 0x23d   : > { %2075 = vmatprep.subr.bf16.mxu0 %v2310_v9  ;;  %2081 = vmatprep.subr.bf16.mxu1 %v2310_v9 }
 0x240   : > { %v659_v12 = vpop.f32.mrb[12].mxu0  ;;  %v711_v13 = vpop.f32.mrb[12].mxu1 }
 0x241   : > { %v931_v17 = vpack.c.bf16 %v659_v12, %v659_v12  ;;  %v932_v19 = vpack.c.bf16 %v711_v13, %v711_v13  ;;  %v2021_v20 = vpop.f32.mrb[13].mxu0  ;;  %v2029_v21 = vpop.f32.mrb[13].mxu1 }
 0x242   : > { %v662_v22 = vpop.f32.mrb[14].mxu0  ;;  %v714_v23 = vpop.f32.mrb[14].mxu1 }
 0x243   : > { %v1034_v24 = vsel %vm937_vm2, %v931_v17, 0  ;;  %v1080_v26 = vsel %vm937_vm2, %v932_v19, 0  ;;  %v2022_v27 = vpop.f32.mrb[15].mxu0  ;;  %v2030_v28 = vpop.f32.mrb[15].mxu1  ;;  %2066 = vmatmul.mubr.msk.bf16.vlgmr.msra.gmra.mrb[24].mxu0 %vm937_vm2, %v925_v14  ;;  %2072 = vmatmul.mubr.msk.bf16.vlgmr.msra.gmra.mrb[24].mxu1 %vm937_vm2, %v926_v15 }
 0x244   : > { %2076 = vmatpush3.bf16.xpose.msra.mxu0 %v1034_v24  ;;  %2082 = vmatpush3.bf16.xpose.msra.mxu1 %v1080_v26 }
 0x245   : > { %2077 = vmatprep.mubr.msk.bf16.mxu0 %vm2311_vm1, %v2310_v9  ;;  %2083 = vmatprep.mubr.msk.bf16.mxu1 %vm2311_vm1, %v2310_v9 }
 0x246   : > { %2087 = vmatprep.subr.bf16.mxu0 %v2310_v9  ;;  %2093 = vmatprep.subr.bf16.mxu1 %v2310_v9 }
 0x248   : > { %v763_v29 = vpop.f32.mrb[16].mxu0  ;;  %v815_v30 = vpop.f32.mrb[16].mxu1 }
 0x249   : > { %v933_v33 = vpack.c.bf16 %v763_v29, %v763_v29  ;;  %v934_v34 = vpack.c.bf16 %v815_v30, %v815_v30  ;;  %v2037_v35 = vpop.f32.mrb[17].mxu0  ;;  %v2045_v36 = vpop.f32.mrb[17].mxu1 }
 0x24a   : > { %v766_v37 = vpop.f32.mrb[18].mxu0  ;;  %v818_v38 = vpop.f32.mrb[18].mxu1 }
 0x24b   : > { %v1176_v39 = vsel %vm1174_vm3, %v933_v33, 0  ;;  %v1222_v40 = vsel %vm1174_vm3, %v934_v34, 0  ;;  %v2038_v41 = vpop.f32.mrb[19].mxu0  ;;  %v2046_v42 = vpop.f32.mrb[19].mxu1  ;;  %2078 = vmatmul.mubr.msk.bf16.vlgmr.msra.gmra.mrb[28].mxu0 %vm937_vm2, %v927_v31  ;;  %2084 = vmatmul.mubr.msk.bf16.vlgmr.msra.gmra.mrb[28].mxu1 %vm937_vm2, %v928_v32 }
 0x24c   : > { %2088 = vmatpush3.bf16.msra.mxu0 %v1176_v39  ;;  %2094 = vmatpush3.bf16.msra.mxu1 %v1222_v40 }
 0x24d   : > { %2089 = vmatprep.mubr.msk.bf16.mxu0 %vm2311_vm1, %v2310_v9  ;;  %2099 = vmatprep.subr.bf16.mxu0 %v2310_v9 }
 0x24e   : > { %2095 = vmatprep.mubr.msk.bf16.mxu1 %vm2311_vm1, %v2310_v9  ;;  %2105 = vmatprep.subr.bf16.mxu1 %v2310_v9 }
 0x250   : > { %v867_v43 = vpop.f32.mrb[20].mxu0  ;;  %v919_v44 = vpop.f32.mrb[20].mxu1 }
 0x251   : > { %v935_v45 = vpack.c.bf16 %v867_v43, %v867_v43  ;;  %v936_v46 = vpack.c.bf16 %v919_v44, %v919_v44  ;;  %v2053_v47 = vpop.f32.mrb[21].mxu0  ;;  %v2061_v48 = vpop.f32.mrb[21].mxu1 }
 0x252   : > { %v870_v49 = vpop.f32.mrb[22].mxu0  ;;  %v922_v50 = vpop.f32.mrb[22].mxu1 }
 0x253   : > { %v2598_v51 = vsel %vm1174_vm3, %v935_v45, 0  ;;  %v2601_v52 = vsel %vm1174_vm3, %v936_v46, 0  ;;  %v2054_v53 = vpop.f32.mrb[23].mxu0  ;;  %v2062_v54 = vpop.f32.mrb[23].mxu1  ;;  %v2216_v49 = vld [vmem:[%s2746_s3] sm:$0xff]  }
 0x254   : > { %v2218_v54 = vld [vmem:[%s2746_s3 + $0x10] sm:$0xff]  }
 0x316   : > { %v978_v55 = vpop.f32.mrb[24].mxu0  ;;  %v1024_v56 = vpop.f32.mrb[24].mxu1 }
 0x317   : > { %v2067_v57 = vpop.f32.mrb[25].mxu0  ;;  %v2073_v58 = vpop.f32.mrb[25].mxu1  ;;  %v1123_v59 = vsel %vm1122_vm4, %v978_v55, -inf  ;;  %v1126_v0 = vsel %vm1122_vm4, %v1024_v56, -inf }
 0x318   : > { %v1027_v60 = vpop.f32.mrb[26].mxu1  ;;  %1124 = vmax.xlane.f32.xlu1 %v1123_v59  ;;  %v981_v61 = vpop.f32.mrb[26].mxu0 }
 0x319   : > { %v2068_v62 = vpop.f32.mrb[27].mxu0  ;;  %v2074_v63 = vpop.f32.mrb[27].mxu1  ;;  %v2219_v60 = vld [vmem:[%s2746_s3 + $0x18] sm:$0xff]  }
 0x31c   : > { %1127 = vmax.xlane.f32.xlu1 %v1126_v0 }
 0x31e   : > { %v1070_v1 = vpop.f32.mrb[28].mxu0  ;;  %v1116_v2 = vpop.f32.mrb[28].mxu1 }
 0x31f   : > { %v2079_v3 = vpop.f32.mrb[29].mxu0  ;;  %v2085_v4 = vpop.f32.mrb[29].mxu1  ;;  %v1132_v5 = vsel %vm1122_vm4, %v1116_v2, -inf  ;;  %v1129_v6 = vsel %vm1122_vm4, %v1070_v1, -inf }
 0x320   : > { %v1119_v7 = vpop.f32.mrb[30].mxu1  ;;  %1133 = vmax.xlane.f32.xlu1 %v1132_v5  ;;  %1130 = vmax.xlane.f32.xlu0 %v1129_v6  ;;  %v1073_v8 = vpop.f32.mrb[30].mxu0 }
 0x321   : > { %v2080_v10 = vpop.f32.mrb[31].mxu0  ;;  %v2086_v11 = vpop.f32.mrb[31].mxu1 }
 0x3a5   : > { %v1125_v12 = vpop.xlane.xlu1 %1124 }
 0x3a6   : > { %v1135_v13 = vsub.f32 %v978_v55, %v1125_v12 }
 0x3a8   : > { %v1139_v14 = vmul.f32 1.442695, %v1135_v13 }
 0x3a9   : > { %v1128_v15 = vpop.xlane.xlu1 %1127 }
 0x3aa   : > { %2226 = vpow2.f32 %v1139_v14  ;;  %v1136_v17 = vsub.f32 %v1024_v56, %v1128_v15 }
 0x3ac   : > { %v1141_v19 = vmul.f32 1.442695, %v1136_v17 }
 0x3ad   : > { %v1134_v20 = vpop.xlane.xlu1 %1133  ;;  %v1131_v21 = vpop.xlane.xlu0 %1130 }
 0x3ae   : > { %2228 = vpow2.f32 %v1141_v19  ;;  %v1138_v22 = vsub.f32 %v1116_v2, %v1134_v20  ;;  %v1137_v23 = vsub.f32 %v1070_v1, %v1131_v21 }
 0x3b0   : > { %v1145_v24 = vmul.f32 1.442695, %v1138_v22  ;;  %v1143_v26 = vmul.f32 1.442695, %v1137_v23 }
 0x3b2   : > { %2230 = vpow2.f32 %v1145_v24 }
 0x3b3   : > { %2232 = vpow2.f32 %v1143_v26  ;;  %v1573_v26 = vsub.s32 2, %v2420_v16 }
 0x3b4   : > { %v2227_v27 = vpop.eup %2226 }
 0x3b5   : > { %v1147_v28 = vsel %vm1122_vm4, %v2227_v27, 0.0 }
 0x3b6   : > { %1148 = vadd.xlane.f32.xlu0 %v1147_v28 }
 0x3b8   : > { %v2229_v29 = vpop.eup %2228 }
 0x3b9   : > { %v1150_v30 = vsel %vm1122_vm4, %v2229_v29, 0.0 }
 0x3ba   : > { %1151 = vadd.xlane.f32.xlu1 %v1150_v30 }
 0x3bc   : > { %v2231_v31 = vpop.eup %2230 }
 0x3bd   : > { %v2233_v32 = vpop.eup %2232  ;;  %v1156_v33 = vsel %vm1122_vm4, %v2231_v31, 0.0 }
 0x3be   : > { %1157 = vadd.xlane.f32.xlu1 %v1156_v33  ;;  %v1153_v34 = vsel %vm1122_vm4, %v2233_v32, 0.0 }
 0x3bf   : > { %1154 = vadd.xlane.f32.xlu0 %v1153_v34  ;;  %v1574_v34 = vrot.slane %v2426_v18, %v1573_v26 }
 0x443   : > { %v1149_v35 = vpop.xlane.xlu0 %1148 }
 0x444   : > { %2234 = vrcp.f32 %v1149_v35 }
 0x447   : > { %v1152_v36 = vpop.xlane.xlu1 %1151 }
 0x448   : > { %2236 = vrcp.f32 %v1152_v36 }
 0x44b   : > { %v1158_v37 = vpop.xlane.xlu1 %1157 }
 0x44c   : > { %2238 = vrcp.f32 %v1158_v37  ;;  %v1155_v38 = vpop.xlane.xlu0 %1154 }
 0x44d   : > { %2240 = vrcp.f32 %v1155_v38 }
 0x44e   : > { %v2235_v39 = vpop.eup %2234 }
 0x44f   : > { %v1163_v40 = vmul.f32 %v2235_v39, %v2227_v27 }
 0x451   : > { %v1167_v41 = vpack.c.bf16 %v1163_v40, %v1163_v40 }
 0x452   : > { %v2237_v42 = vpop.eup %2236 }
 0x453   : > { %v1164_v43 = vmul.f32 %v2237_v42, %v2229_v29  ;;  %2090 = vmatmul.mubr.msk.bf16.vlgmr.msra.gmra.mrb[32].mxu0 %vm1122_vm4, %v1167_v41 }
 0x454   : > { %2100 = vmatpush3.bf16.msra.mxu0 %v2598_v51  ;;  %2101 = vmatprep.mubr.msk.bf16.mxu0 %vm2311_vm1, %v2310_v9 }
 0x455   : > { %v1168_v44 = vpack.c.bf16 %v1164_v43, %v1164_v43  ;;  %2111 = vmatprep.subr.bf16.mxu0 %v2310_v9 }
 0x456   : > { %v2239_v45 = vpop.eup %2238 }
 0x457   : > { %v2241_v46 = vpop.eup %2240  ;;  %2096 = vmatmul.mubr.msk.bf16.vlgmr.msra.gmra.mrb[32].mxu1 %vm1122_vm4, %v1168_v44  ;;  %v1166_v48 = vmul.f32 %v2239_v45, %v2231_v31 }
 0x458   : > { %v1165_v47 = vmul.f32 %v2241_v46, %v2233_v32  ;;  %2106 = vmatpush3.bf16.msra.mxu1 %v2601_v52  ;;  %2107 = vmatprep.mubr.msk.bf16.mxu1 %vm2311_vm1, %v2310_v9  ;;  %v2217_v52 = vld [vmem:[%s2746_s3 + $0x8] sm:$0xff]  }
 0x459   : > { %2117 = vmatprep.subr.bf16.mxu1 %v2310_v9  ;;  %v1170_v51 = vpack.c.bf16 %v1166_v48, %v1166_v48  ;;  %v2220_v48 = vld [vmem:[%s2747_s4] sm:$0xff]  }
 0x45a   : > { %v1169_v50 = vpack.c.bf16 %v1165_v47, %v1165_v47 }
 0x45c   : > { %2102 = vmatmul.mubr.msk.bf16.vlgmr.msra.gmra.mrb[36].mxu0 %vm1122_vm4, %v1169_v50 }
 0x45d   : > { %2112 = vmatpush3.bf16.msra.mxu0 %v2216_v49  ;;  %2113 = vmatprep.mubr.msk.bf16.mxu0 %vm2311_vm1, %v2310_v9  ;;  %v2221_v49 = vld [vmem:[%s2747_s4 + $0x8] sm:$0xff]  }
 0x45e   : > { %2123 = vmatprep.subr.bf16.mxu0 %v2310_v9 }
 0x45f   : > { %2108 = vmatmul.mubr.msk.bf16.vlgmr.msra.gmra.mrb[36].mxu1 %vm1122_vm4, %v1170_v51 }
 0x460   : > { %2119 = vmatprep.mubr.msk.bf16.mxu1 %vm2311_vm1, %v2310_v9  ;;  %2118 = vmatpush3.bf16.msra.mxu1 %v2217_v52  ;;  %v1592_v52 = vsub.s32 3, %v2420_v16 }
 0x461   : > { %2129 = vmatprep.subr.bf16.mxu1 %v2310_v9 }
 0x526   : > { %v1212_v53 = vpop.f32.mrb[32].mxu0 }
 0x527   : > { %v1356_v55 = vpack.c.bf16 %v1212_v53, %v1212_v53  ;;  %v2091_v56 = vpop.f32.mrb[33].mxu0  ;;  %v1597_v53 = vsub.s32 4, %v2420_v16 }
 0x528   : > { %v1215_v57 = vpop.f32.mrb[34].mxu0 }
 0x529   : > { %v2092_v58 = vpop.f32.mrb[35].mxu0  ;;  %2114 = vmatmul.mubr.msk.bf16.vlgmr.msra.gmra.mrb[40].mxu0 %vm937_vm2, %v1356_v55  ;;  %v1598_v57 = vrot.slane %v2426_v18, %v1597_v53 }
 0x52a   : > { %v1258_v59 = vpop.f32.mrb[32].mxu1  ;;  %2124 = vmatpush3.bf16.msra.mxu0 %v2218_v54  ;;  %2125 = vmatprep.mubr.msk.bf16.mxu0 %vm2311_vm1, %v2310_v9  ;;  %v1593_v54 = vrot.slane %v2426_v18, %v1592_v52 }
 0x52b   : > { %v1357_v61 = vpack.c.bf16 %v1258_v59, %v1258_v59  ;;  %v2097_v62 = vpop.f32.mrb[33].mxu1  ;;  %2135 = vmatprep.subr.bf16.mxu0 %v2310_v9 }
 0x52c   : > { %v1261_v63 = vpop.f32.mrb[34].mxu1  ;;  %v2223_v62 = vld [vmem:[%s2747_s4 + $0x18] sm:$0xff]  }
 0x52d   : > { %v2098_v0 = vpop.f32.mrb[35].mxu1  ;;  %2120 = vmatmul.mubr.msk.bf16.vlgmr.msra.gmra.mrb[40].mxu1 %vm937_vm2, %v1357_v61  ;;  %v2222_v61 = vld [vmem:[%s2747_s4 + $0x10] sm:$0xff]   ;;  %v1607_v63 = vsub.s32 5, %v2420_v16 }
 0x52e   : > { %2130 = vmatpush3.bf16.msra.mxu1 %v2219_v60  ;;  %2131 = vmatprep.mubr.msk.bf16.mxu1 %vm2311_vm1, %v2310_v9 }
 0x52f   : > { %v1304_v1 = vpop.f32.mrb[36].mxu0  ;;  %2143 = vmatprep.subr.bf16.mxu1 %v2310_v9  ;;  %v1608_v0 = vrot.slane %v2426_v18, %v1607_v63 }
 0x530   : > { %v1358_v2 = vpack.c.bf16 %v1304_v1, %v1304_v1  ;;  %v2103_v3 = vpop.f32.mrb[37].mxu0 }
 0x531   : > { %v1307_v4 = vpop.f32.mrb[38].mxu0 }
 0x532   : > { %v2104_v5 = vpop.f32.mrb[39].mxu0  ;;  %2126 = vmatmul.mubr.msk.bf16.vlgmr.msra.gmra.mrb[44].mxu0 %vm937_vm2, %v1358_v2  ;;  %v1350_v6 = vpop.f32.mrb[36].mxu1 }
 0x533   : > { %v1359_v7 = vpack.c.bf16 %v1350_v6, %v1350_v6  ;;  %v2109_v8 = vpop.f32.mrb[37].mxu1  ;;  %2139 = vmatprep.mubr.msk.bf16.mxu0 %vm2311_vm1, %v2310_v9  ;;  %2136 = vmatpush3.bf16.msra.mxu0 %v2220_v48 }
 0x534   : > { %v1353_v10 = vpop.f32.mrb[38].mxu1  ;;  %2137 = vmatprep.subr.bf16.mxu0 %v2310_v9 }
 0x535   : > { %v2110_v11 = vpop.f32.mrb[39].mxu1  ;;  %2132 = vmatmul.mubr.msk.bf16.vlgmr.msra.gmra.mrb[44].mxu1 %vm937_vm2, %v1359_v7 }
 0x536   : > { %2147 = vmatprep.mubr.msk.bf16.mxu1 %vm2311_vm1, %v2310_v9  ;;  %2144 = vmatpush3.bf16.msra.mxu1 %v2222_v61 }
 0x537   : > { %2138 = vmatpush3.bf16.msra.mxu0 %v2221_v49  ;;  %2145 = vmatprep.subr.bf16.mxu1 %v2310_v9  ;;  %v1673_v9 = vsub.s32 6, %v2420_v16 }
 0x539   : > { %v1674_v8 = vrot.slane %v2426_v18, %v1673_v9 }
 0x53a   : > { %2146 = vmatpush3.bf16.msra.mxu1 %v2223_v62 }
 0x5fc   : > { %v1411_v12 = vpop.f32.mrb[40].mxu0 }
 0x5fd   : > { %v2115_v13 = vpop.f32.mrb[41].mxu0  ;;  %v1564_v19 = vsel %vm224_vm0, %v1411_v12, 0.0 }
 0x5fe   : > { %v1414_v14 = vpop.f32.mrb[42].mxu0 }
 0x5ff   : > { %v2116_v15 = vpop.f32.mrb[43].mxu0 }
 0x600   : > { %v1460_v17 = vpop.f32.mrb[40].mxu1 }
 0x601   : > { %v1565_v20 = vsel %vm224_vm0, %v1460_v17, 0.0  ;;  %v2121_v21 = vpop.f32.mrb[41].mxu1 }
 0x602   : > { %v1566_v22 = vadd.f32 %v1565_v20, %v1564_v19  ;;  %v1463_v23 = vpop.f32.mrb[42].mxu1 }
 0x603   : > { %v2122_v24 = vpop.f32.mrb[43].mxu1 }
 0x605   : > { %v1509_v27 = vpop.f32.mrb[44].mxu0 }
 0x606   : > { %v1567_v28 = vsel %vm224_vm0, %v1509_v27, 0.0  ;;  %v2127_v29 = vpop.f32.mrb[45].mxu0 }
 0x607   : > { %v1568_v30 = vadd.f32 %v1567_v28, %v1566_v22  ;;  %v1512_v31 = vpop.f32.mrb[46].mxu0  ;;  %v1746_v28 = vsub.s32 7, %v2420_v16 }
 0x608   : > { %v2128_v32 = vpop.f32.mrb[47].mxu0  ;;  %v1558_v33 = vpop.f32.mrb[44].mxu1 }
 0x609   : > { %v1569_v35 = vsel %vm224_vm0, %v1558_v33, 0.0  ;;  %v2133_v36 = vpop.f32.mrb[45].mxu1  ;;  %v1747_v29 = vrot.slane %v2426_v18, %v1746_v28  ;;  %v1896_v32 = vld [vmem:[%s2744_s1 + $0x8] ss:$0 sm:$0xff] }
 0x60a   : > { %v1570_v37 = vadd.f32 %v1569_v35, %v1568_v30  ;;  %v1561_v38 = vpop.f32.mrb[46].mxu1 }
 0x60b   : > { %v2134_v39 = vpop.f32.mrb[47].mxu1 }
 0x60c   : > { %v1575_v40 = vadd.f32 %v1574_v34, %v1570_v37 }
 0x60e   : > { %v1576_v41 = vadd.f32 %v1575_v40, %v2431_v25 }
 0x610   : > { %v1577_v42 = vsel %vm224_vm0, %v1576_v41, 0.0 }
 0x611   : > { %1578 = vadd.xlane.f32.xlu0 %v1577_v42 }
 0x69e   : > { %v1579_v43 = vpop.xlane.xlu0 %1578 }
 0x69f   : > { %v1580_v44 = vmul.f32 0.03125, %v1579_v43 }
 0x6a1   : > { %v1581_v45 = vsub.f32 %v1576_v41, %v1580_v44 }
 0x6a3   : > { %v1582_v46 = vmul.f32 %v1581_v45, %v1581_v45 }
 0x6a5   : > { %v1583_v47 = vsel %vm224_vm0, %v1582_v46, 0.0 }
 0x6a6   : > { %1584 = vadd.xlane.f32.xlu1 %v1583_v47 }
 0x733   : > { %v1585_v25 = vpop.xlane.xlu1 %1584 }
 0x734   : > { %v1586_v50 = vmul.f32 0.03125, %v1585_v25 }
 0x736   : > { %v1587_v51 = vadd.f32 1e-05, %v1586_v50 }
 0x738   : > { %2242 = vrsqrt.f32 %v1587_v51 }
 0x742   : > { %v2243_v55 = vpop.eup %2242 }
 0x743   : > { %v1589_v56 = vmul.f32 %v2243_v55, %v1581_v45 }
 0x745   : > { %v1594_v58 = vmul.f32 %v1593_v54, %v1589_v56 }
 0x747   : > { %v1599_v59 = vadd.f32 %v1598_v57, %v1594_v58 }
 0x749   : > { %v1600_v60 = vpack.c.bf16 %v1599_v59, %v1599_v59 }
 0x74b   : > { %2140 = vmatmul.mubr.msk.bf16.vlgmr.msra.gmra.mrb[48].mxu0 %vm224_vm0, %v1600_v60 }
 0x81e   : > { %v1658_v1 = vpop.f32.mrb[48].mxu0 }
 0x81f   : > { %v1659_v2 = vadd.f32 %v1658_v1, %v1608_v0  ;;  %v2141_v3 = vpop.f32.mrb[49].mxu0 }
 0x820   : > { %v1661_v4 = vpop.f32.mrb[50].mxu0 }
 0x821   : > { %v1664_v5 = vmax.f32 %v1659_v2, 0.0  ;;  %v2142_v6 = vpop.f32.mrb[51].mxu0 }
 0x823   : > { %v1665_v7 = vpack.c.bf16 %v1664_v5, %v1664_v5 }
 0x825   : > { %2148 = vmatmul.mubr.msk.bf16.vlgmr.msra.gmra.mrb[48].mxu1 %vm224_vm0, %v1665_v7 }
 0x8f8   : > { %v1724_v10 = vpop.f32.mrb[48].mxu1 }
 0x8f9   : > { %v1725_v11 = vadd.f32 %v1724_v10, %v1674_v8  ;;  %v2149_v12 = vpop.f32.mrb[49].mxu1 }
 0x8fa   : > { %v1727_v13 = vpop.f32.mrb[50].mxu1 }
 0x8fb   : > { %v2150_v14 = vpop.f32.mrb[51].mxu1  ;;  %v1730_v15 = vadd.f32 %v1725_v11, %v1599_v59 }
 0x8fd   : > { %v1731_v17 = vsel %vm224_vm0, %v1730_v15, 0.0 }
 0x8fe   : > { %1732 = vadd.xlane.f32.xlu0 %v1731_v17 }
 0x98b   : > { %v1733_v19 = vpop.xlane.xlu0 %1732 }
 0x98c   : > { %v1734_v20 = vmul.f32 0.03125, %v1733_v19 }
 0x98e   : > { %v1735_v21 = vsub.f32 %v1730_v15, %v1734_v20 }
 0x990   : > { %v1736_v22 = vmul.f32 %v1735_v21, %v1735_v21 }
 0x992   : > { %v1737_v23 = vsel %vm224_vm0, %v1736_v22, 0.0 }
 0x993   : > { %1738 = vadd.xlane.f32.xlu1 %v1737_v23 }
 0xa20   : > { %v1739_v24 = vpop.xlane.xlu1 %1738 }
 0xa21   : > { %v1740_v26 = vmul.f32 0.03125, %v1739_v24 }
 0xa23   : > { %v1741_v27 = vadd.f32 1e-05, %v1740_v26 }
 0xa25   : > { %2244 = vrsqrt.f32 %v1741_v27 }
 0xa2f   : > { %v2245_v30 = vpop.eup %2244 }
 0xa30   : > { %v1743_v31 = vmul.f32 %v2245_v30, %v1735_v21 }
 0xa32   : > { %v1748_v33 = vmul.f32 %v1747_v29, %v1743_v31 }
 0xa34   : > { %v1753_v34 = vadd.f32 %v1896_v32, %v1748_v33 }
 0xa36   : > { %1754 = vst.msk [vmem:[%s215_s17] sm:$0xff] %vm224_vm0, %v1753_v34 }
 0xa37   : > { %2259 = shalt.err (!%p2256_p3)
}
 0xa38   : > { %s2260_s10 = scalar_lea.hbm %s2700_s30, 128  ;;  %s2264_s13 = scalar_lea.hbm %s2748_s5, 256 }
 0xa39   : > { %p2261_p4 = scmp.ne.s32.totalorder %s2700_s30, %s2260_s10  ;;  %p2265_p9 = scmp.lt.u32.totalorder %s2700_s30, %s2748_s5 }
 0xa3a   : > { %p2266_p10 = scmp.lt.u32.totalorder %s2264_s13, %s2260_s10  ;;  %p2268_p12 = scmp.lt.u32.totalorder %s2260_s10, %s2700_s30 }
 0xa3b   : > { %p2262_p7 = pnand %p2261_p4, %p2381_p5 }
 0xa3c   : > { %p2267_p11 = por %p2266_p10, %p2265_p9 }
 0xa3d   : > { %p2263_p8 = pneg %p2262_p7 }
 0xa3e   : > { %p2269_p13 = por %p2268_p12, %p2267_p11 }
 0xa40   : > { %p2270_p0 = pnand %p2269_p13, %p2263_p8 }
 0xa42   : > { %2273 = shalt.err (!%p2270_p0)
}
 0xa43   : > { %2151 = dma.vmem_to_hbm [thread:$0]  (%p2381_p5), %s2702_s23, 128, %s2700_s30, %s1756_s6  }
 0xa44 PF: > { %p2157_p1 = scmp.ge.s32.totalorder %s2308_s21, 2  ;;  %s1781_s16 = sand.u32 1, %s2296_s18  }
 0xa45   : > { %s1782_s17 = scalar_lea.sflag [#allocation3], %s1781_s16 }
 0xa46   : > { %p2154_p2 = pnand %p2157_p1, %p2385_p6 }
 0xa48   : > { %2291 = dma.done.wait (!%p2154_p2), %s1782_s17, 128  }
 0xa49   : > { %2293 = vsyncadd (!%p2154_p2), %s1782_s17, 4294967168  ;;  %p15_p3 = scmp.ge.s32.totalorder %s2368_s24, 4   ;;  %s2751_s18 = smov %s2300_s19 }
 0xa4a   : > { %s2752_s19 = smov %s2304_s20  ;;  %s2753_s20 = smov %s2379_s27 }
 0xa4b   : > { %s2754_s21 = smov %s2368_s24  ;;  %17 = sbr.rel (!%p15_p3) target bundleno = 3 (0x3), region = 76 }
 0xa52   :  { %1787 = vsyncpa [#allocation3], 1 }
 0xa53   :  { %1789 = vsyncpa [#allocation3 + $0x1], 1 }

</bundles_post_ra>
